<compile_context>
chip_gen: v6e
topology: v6e:2x2x1
jax: 0.10.0
libtpu: 0.0.40
codegen_flags: <defaults>
</compile_context>

<pallas_src>
import jax
import jax.numpy as jnp
from jax.experimental import pallas as pl
from jax.experimental.pallas import tpu as pltpu


_TARGET_BLOCK_BYTES = 4 * 1024 * 1024   # ~4 MiB of output per grid step
_MIN_BLOCK_BYTES = 512 * 1024           # don't shrink blocks below ~0.5 MiB
_MIN_GRID_STEPS = 8                     # keep v7x megacore reasonably balanced
_IDS_SUBLANE_PACK = 32                  # int8 sublane granule


def _round_up(a, b):
    return ((a + b - 1) // b) * b


def _sublane_pack(itemsize):
    # f32 -> 8, bf16/f16 -> 16, int8/fp8 -> 32
    return {4: 8, 2: 16, 1: 32}.get(itemsize, 8)


def _choose_tiles(batch, pos, d_model, itemsize):
    """Pick (tile_b, tile_p) giving ~4 MiB, sublane-pack-aligned output blocks."""
    pack = _sublane_pack(itemsize)
    gran = max(pack, _IDS_SUBLANE_PACK)        # also legal for the int8 ids block
    row_bytes = d_model * itemsize
    plane_bytes = pos * row_bytes              # one batch element worth of output

    if plane_bytes <= _TARGET_BLOCK_BYTES:
        # Tile over batch only; pos stays at full extent (always a legal block).
        tile_p = pos
        tile_b = min(max(1, _TARGET_BLOCK_BYTES // plane_bytes), batch)
        balanced = max(1, batch // _MIN_GRID_STEPS)
        if balanced < tile_b and balanced * plane_bytes >= _MIN_BLOCK_BYTES:
            tile_b = balanced                  # more grid steps for megacore
    else:
        # Tile over pos; one batch element per block.
        tile_b = 1
        tile_p = max(gran, (_TARGET_BLOCK_BYTES // row_bytes) // gran * gran)
        want_p_steps = max(1, -(-_MIN_GRID_STEPS // max(batch, 1)))
        balanced = _round_up(-(-pos // want_p_steps), gran)
        if balanced < tile_p and balanced * row_bytes >= _MIN_BLOCK_BYTES:
            tile_p = balanced
        tile_p = min(tile_p, pos)
    return tile_b, tile_p


def _token_type_embed_kernel(ids_ref, w_ref, o_ref):
    # ids_ref: (tile_b, tile_p, 1) int8   per-row token-type id, on sublanes
    # w_ref:   (2, d_model)               full embedding table, grid-invariant
    # o_ref:   (tile_b, tile_p, d_model)  lane-dense output block
    sel = ids_ref[...] != 0                # (tile_b, tile_p, 1) bool
    w0 = w_ref[0]                          # (d_model,) — stride-0 broadcasts,
    w1 = w_ref[1]                          # no explicit full-tile temporaries
    o_ref[...] = jnp.where(sel, w1, w0).astype(o_ref.dtype)


@jax.jit
def token_type_embed_pallas(token_type_ids, w_token_type):
    """token_type_ids: (batch, pos) int; w_token_type: (2, d_model)."""
    batch, pos = token_type_ids.shape
    n_types, d_model = w_token_type.shape
    if n_types != 2:
        raise ValueError("TokenTypeEmbed expects a 2-row token-type table.")
    itemsize = jnp.dtype(w_token_type.dtype).itemsize

    tile_b, tile_p = _choose_tiles(batch, pos, d_model, itemsize)
    grid = (pl.cdiv(batch, tile_b), pl.cdiv(pos, tile_p))

    # int8 ids with a trailing size-1 lane dim: rows map to sublanes so the
    # kernel needs no lane->sublane relayout; int8 keeps the lane-padded DMA
    # traffic 4x lower than int32.  (Ids other than 0/1 select row 1, whereas
    # the reference gather would index out of bounds — acceptable for a 2-type
    # table.)
    ids8 = token_type_ids.astype(jnp.int8).reshape(batch, pos, 1)

    pack = _sublane_pack(itemsize)
    cost = pl.CostEstimate(
        flops=batch * pos * d_model,                     # one select per element
        transcendentals=0,
        bytes_accessed=(
            batch * _round_up(pos, _IDS_SUBLANE_PACK) * 128        # ids (lane padded)
            + n_types * d_model * itemsize                         # table
            + batch * _round_up(pos, pack) * d_model * itemsize),  # output
    )

    return pl.pallas_call(
        _token_type_embed_kernel,
        out_shape=jax.ShapeDtypeStruct((batch, pos, d_model), w_token_type.dtype),
        grid_spec=pltpu.PrefetchScalarGridSpec(
            num_scalar_prefetch=0,
            grid=grid,
            in_specs=[
                pl.BlockSpec((tile_b, tile_p, 1), lambda b, p: (b, p, 0)),
                # 2 x d_model table, tiny and grid-invariant -> stays resident.
                pl.BlockSpec((n_types, d_model), lambda b, p: (0, 0)),
            ],
            out_specs=pl.BlockSpec((tile_b, tile_p, d_model),
                                   lambda b, p: (b, p, 0)),
        ),
        compiler_params=pltpu.CompilerParams(
            dimension_semantics=("parallel", "parallel"),
            vmem_limit_bytes=32 * 1024 * 1024,
        ),
        cost_estimate=cost,
    )(ids8, w_token_type)


def token_type_embed_reference(token_type_ids, w_token_type):
    return jnp.take(w_token_type, token_type_ids, axis=0)


if __name__ == "__main__":
    key = jax.random.PRNGKey(0)
    k_ids, k_w, k_ids2, k_w2, k_w3 = jax.random.split(key, 5)

    # Small config consistent with the module: (batch, pos) ids, (2, d_model) table.
    batch, pos, d_model = 2, 8, 128
    token_type_ids = jax.random.randint(k_ids, (batch, pos), 0, 2, dtype=jnp.int32)
    w_token_type = jax.random.normal(k_w, (2, d_model), dtype=jnp.float32)

    out = jax.block_until_ready(token_type_embed_pallas(token_type_ids, w_token_type))
    ref = token_type_embed_reference(token_type_ids, w_token_type)
    assert out.shape == (batch, pos, d_model)
    assert jnp.array_equal(out, ref), "mismatch vs reference gather (f32)"

    # Ragged pos (not a multiple of the sublane pack): handled with no padding,
    # slicing or reshape copies (the block covers the full pos extent).
    out_odd = jax.block_until_ready(
        token_type_embed_pallas(token_type_ids[:, :5], w_token_type))
    ref_odd = token_type_embed_reference(token_type_ids[:, :5], w_token_type)
    assert jnp.array_equal(out_odd, ref_odd), "mismatch vs reference (ragged pos)"

    # Multi-step grid over batch (tile_b shrinks for megacore balance).
    b2, p2, d2 = 5, 512, 256
    ids_big = jax.random.randint(k_ids2, (b2, p2), 0, 2, dtype=jnp.int32)
    w_big = jax.random.normal(k_w2, (2, d2), dtype=jnp.float32)
    out_big = jax.block_until_ready(token_type_embed_pallas(ids_big, w_big))
    ref_big = token_type_embed_reference(ids_big, w_big)
    assert jnp.array_equal(out_big, ref_big), "mismatch vs reference (multi-block)"

    # bf16 table (16-row sublane pack path).
    w_bf16 = jax.random.normal(k_w3, (2, d_model), dtype=jnp.bfloat16)
    out_bf16 = jax.block_until_ready(token_type_embed_pallas(token_type_ids, w_bf16))
    ref_bf16 = token_type_embed_reference(token_type_ids, w_bf16)
    assert jnp.array_equal(out_bf16, ref_bf16), "mismatch vs reference (bf16)"

    print("KERNEL_OK")
</pallas_src>

<mosaic_0001>
module attributes {stable_mosaic.version = 11 : i64} {
  func.func @_token_type_embed_kernel(%arg0: i32, %arg1: i32, %arg2: memref<2x8x1xi8, #tpu.memory_space<vmem>>, %arg3: memref<2x128xf32, #tpu.memory_space<vmem>>, %arg4: memref<2x8x128xf32, #tpu.memory_space<vmem>>) attributes {dimension_semantics = [#tpu.dimension_semantics<parallel>, #tpu.dimension_semantics<parallel>], iteration_bounds = array<i64: 1, 1>, scalar_prefetch = 0 : i64, scratch_operands = 0 : i64, tpu.core_type = #tpu.core_type<tc>, window_params = [{transform_indices = @transform_0, window_bounds = array<i64: 2, 8, 1>}, {pipeline_mode = #tpu.pipeline_mode<synchronous>, transform_indices = @transform_1, window_bounds = array<i64: 2, 128>}, {transform_indices = @transform_2, window_bounds = array<i64: 2, 8, 128>}]} {
    %c0 = arith.constant 0 : index
    %c0_0 = arith.constant 0 : index
    %c0_1 = arith.constant 0 : index
    %0 = vector.load %arg2[%c0, %c0_0, %c0_1] : memref<2x8x1xi8, #tpu.memory_space<vmem>>, vector<2x8x1xi8>
    %c0_i8 = arith.constant 0 : i8
    %1 = vector.broadcast %c0_i8 : i8 to vector<2x8x1xi8>
    %2 = arith.cmpi ne, %0, %1 : vector<2x8x1xi8>
    %c0_2 = arith.constant 0 : index
    %c0_3 = arith.constant 0 : index
    %3 = vector.load %arg3[%c0_2, %c0_3] : memref<2x128xf32, #tpu.memory_space<vmem>>, vector<1x128xf32>
    %4 = vector.shape_cast %3 : vector<1x128xf32> to vector<128xf32>
    %c1 = arith.constant 1 : index
    %c0_4 = arith.constant 0 : index
    %5 = vector.load %arg3[%c1, %c0_4] : memref<2x128xf32, #tpu.memory_space<vmem>>, vector<1x128xf32>
    %6 = vector.shape_cast %5 : vector<1x128xf32> to vector<128xf32>
    %7 = vector.shape_cast %2 : vector<2x8x1xi1> to vector<2x8x1xi1>
    %8 = vector.broadcast %7 : vector<2x8x1xi1> to vector<2x8x128xi1>
    %9 = vector.shape_cast %6 : vector<128xf32> to vector<1x1x128xf32>
    %10 = vector.broadcast %9 : vector<1x1x128xf32> to vector<2x8x128xf32>
    %11 = vector.shape_cast %4 : vector<128xf32> to vector<1x1x128xf32>
    %12 = vector.broadcast %11 : vector<1x1x128xf32> to vector<2x8x128xf32>
    %13 = arith.select %8, %10, %12 : vector<2x8x128xi1>, vector<2x8x128xf32>
    %c0_5 = arith.constant 0 : index
    %c0_6 = arith.constant 0 : index
    %c0_7 = arith.constant 0 : index
    %14 = vector.load %arg4[%c0_5, %c0_6, %c0_7] : memref<2x8x128xf32, #tpu.memory_space<vmem>>, vector<2x8x128xf32>
    tpu.vector_store %arg4[%c0_5, %c0_6, %c0_7], %13 {strides = array<i32>} : memref<2x8x128xf32, #tpu.memory_space<vmem>>, vector<2x8x128xf32>,
    return
  }
  func.func @transform_0(%arg0: i32, %arg1: i32) -> (i32, i32, i32) {
    %c0_i32 = arith.constant 0 : i32
    %c0_i32_0 = arith.constant 0 : i32
    return %arg0, %arg1, %c0_i32 : i32, i32, i32
  }
  func.func @transform_1(%arg0: i32, %arg1: i32) -> (i32, i32) {
    %c0_i32 = arith.constant 0 : i32
    %c0_i32_0 = arith.constant 0 : i32
    %c0_i32_1 = arith.constant 0 : i32
    return %c0_i32, %c0_i32_0 : i32, i32
  }
  func.func @transform_2(%arg0: i32, %arg1: i32) -> (i32, i32, i32) {
    %c0_i32 = arith.constant 0 : i32
    %c0_i32_0 = arith.constant 0 : i32
    return %arg0, %arg1, %c0_i32 : i32, i32, i32
  }
}

</mosaic_0001>

<bundles_post_ra>
// kernel: token_type_embed_pallas.1
= control target key start
LH: loop header
LB: loop body
LE: loop exit
PB: predicated region body
PF: predicated region fallthrough
CT: control target
= control target key end

     0   :  { %v93_v2 = vmov 0   ;;  %s127_s0 = inlined_call_operand.vmem [shape: s8[2,8,1], index: 0, kind: input, shape index: {}]   ;;  %s128_s1 = inlined_call_operand.vmem [shape: f32[2,128], index: 1, kind: input, shape index: {}]   ;;  %s129_s2 = inlined_call_operand.hbm [shape: f32[2,8,128], index: 2, kind: output, shape index: {}]  }
   0x1   :  { %v14_v0 = vld [vmem:[%s127_s0] sm:$0x3]  ;;  %v15_v1 = vld [vmem:[%s127_s0 + $0x2] sm:$0x3]  ;;  %70 = vset.pattern.permute.xlu0 %v93_v2 }
   0x2   :  { %vm16_vm0 = vnez %v14_v0  ;;  %vm17_vm1 = vnez %v15_v1 }
   0x3   :  { %7 = vsyncpa [#allocation3], 0  ;;  %v20_v3 = vsel %vm16_vm0, 16843009, %v93_v2  ;;  %v21_v4 = vsel %vm17_vm1, 16843009, %v93_v2 }
   0x4   :  { %v22_v5 = vunpack.c.0.s8 %v20_v3  ;;  %v23_v6 = vunpack.c.0.s8 %v21_v4  ;;  %v65_v9 = vld [vmem:[%s128_s1] ss:$0 sm:$0xff]  ;;  %v64_v10 = vld [vmem:[%s128_s1 + $0x1] ss:$0 sm:$0xff]  ;;  %s94_s16 = smov [#allocation2]  }
   0x5   :  { %s53_s17 = sshll.u32 %s94_s16, 4  ;;  %s54_s17 = int_to_ptr.vmem [resolvable:$true] %s53_s17 }
   0x6   :  { %vm24_vm2 = vcmp.ne.s32.totalorder %v22_v5, 0  ;;  %vm25_vm3 = vcmp.ne.s32.totalorder %v23_v6, 0  ;;  %s71_s18 = scalar_lea.vmem %s54_s17, 256  ;;  %p76_p1 = scmp.lt.s32.totalorder %s54_s17, %s54_s17 }
   0x7   :  { %v26_v7 = vsel %vm24_vm2, 1, %v93_v2  ;;  %v27_v8 = vsel %vm25_vm3, 1, %v93_v2  ;;  %p72_p0 = scmp.ne.s32.totalorder %s54_s17, %s71_s18  ;;  %p77_p2 = scmp.lt.s32.totalorder %s71_s18, %s71_s18 }
   0x8   :  { %29 = vperm.xlu0 %70, %v26_v7  }
   0x9   :  { %p78_p3 = por %p77_p2, %p76_p1 }
   0xb   :  { %p79_p4 = pnand %p78_p3, %p72_p0 }
   0xc   :  { %32 = vperm.xlu0 %70, %v27_v8  }
  0x83   :  { %v30_v11 = vpop.permute.xlu0 %29 }
  0x84   :  { %vm34_vm4 = vcmp.eq.s32.totalorder %v30_v11, 1 }
  0x85   :  { %v44_v12 = vsel %vm34_vm4, %v64_v10, %v65_v9 }
  0x86   :  { %46 = vst [vmem:[#allocation2] sm:$0xff] %v44_v12 }
  0x87   :  { %v33_v13 = vpop.permute.xlu0 %32 }
  0x88   :  { %vm35_vm5 = vcmp.eq.s32.totalorder %v33_v13, 1 }
  0x89   :  { %v45_v14 = vsel %vm35_vm5, %v64_v10, %v65_v9 }
  0x8a   :  { %47 = vst [vmem:[#allocation2 + $0x8] sm:$0xff] %v45_v14 }
  0x8b   :  { %82 = shalt.err (!%p79_p4)
}
  0x8c   :  { %s95_s19 = smov 128   ;;  %s96_s1 = smov 8  }
  0x8d   :  { %59 = dma.vmem_to_hbm [thread:$0]  %s54_s17, 256, %s129_s2, [#allocation3], %s95_s19, %s95_s19, %s96_s1  }
  0x8e   :  { %91 = dma.done.wait [#allocation3], 256  }
  0x8f   :  { %92 = vsyncadd [#allocation3], 4294967040 }
  0x90   :  { %63 = vsyncpa [#allocation3], 1 }

</bundles_post_ra>
